<compile_context>
chip_gen: v6e
topology: v6e:2x2x1
jax: 0.10.0
libtpu: 0.0.40
codegen_flags: <defaults>
</compile_context>

<pallas_src>
import jax
import jax.numpy as jnp
from jax.experimental import pallas as pl
from jax.experimental.pallas import tpu as pltpu

HIDDEN = 32          # seed dim / hidden dim of the MLP
ID_CODE_DIM = 32     # uhm.id_code_dim (synthetic choice, documented)
LANES = 128          # TPU lane width
PACK = LANES // ID_CODE_DIM          # 4 identical rows packed per 128-lane row
TILE_PACKED_ROWS = 2048              # packed rows per block -> 1 MiB f32 block
                                     # (2 MiB double-buffered: fits v5e/v6e/v7x
                                     #  scoped-VMEM defaults with headroom)


def idnet_kernel(seed_ref, w1_ref, b1_ref, w2_ref, b2_ref, out_ref):
    # seed_ref: (1, HIDDEN)        w1_ref: (HIDDEN, HIDDEN)    b1_ref: (1, HIDDEN)
    # w2_ref:  (HIDDEN, ID_DIM)    b2_ref: (1, ID_DIM)
    # out_ref: (TILE_PACKED_ROWS, LANES)  -- lane-packed output tile
    seed = seed_ref[...]
    # Linear(32 -> 32) + ReLU
    h = jnp.dot(seed, w1_ref[...], preferred_element_type=jnp.float32) + b1_ref[...]
    h = jnp.maximum(h, 0.0)
    # Linear(32 -> id_code_dim), no final ReLU (relu_final=False)
    y = jnp.dot(h, w2_ref[...], preferred_element_type=jnp.float32) + b2_ref[...]
    # Lane-pack: 4 identical 32-wide rows side by side -> one dense 128-lane row,
    # then sublane-broadcast across the tile.  Store is a full-width vst.
    row = jnp.tile(y, (1, PACK))                         # (1, LANES)
    out_ref[...] = jnp.broadcast_to(row, out_ref.shape).astype(out_ref.dtype)


def idnet_forward(batch_size, seed, w1, b1, w2, b2):
    """Runs the IDNet forward pass. Returns (batch_size, ID_CODE_DIM) float32."""
    seed2d = seed.reshape(1, HIDDEN)
    b1_2d = b1.reshape(1, HIDDEN)
    b2_2d = b2.reshape(1, ID_CODE_DIM)

    # Pad the batch up to a multiple of PACK so rows pack cleanly into 128 lanes.
    n_rows_padded = pl.cdiv(batch_size, PACK) * PACK     # unpacked rows
    n_packed = n_rows_padded // PACK                     # packed (128-lane) rows

    # Block size: multiple of 8 sublanes, capped at TILE_PACKED_ROWS, shrunk for
    # tiny batches so we don't allocate a huge mostly-padded block.
    tile = min(TILE_PACKED_ROWS, ((n_packed + 7) // 8) * 8)
    grid = (pl.cdiv(n_packed, tile),)

    full_in = lambda shape: pl.BlockSpec(shape, lambda i: (0, 0))

    packed = pl.pallas_call(
        idnet_kernel,
        out_shape=jax.ShapeDtypeStruct((n_packed, LANES), jnp.float32),
        grid=grid,
        in_specs=[
            full_in((1, HIDDEN)),
            full_in((HIDDEN, HIDDEN)),
            full_in((1, HIDDEN)),
            full_in((HIDDEN, ID_CODE_DIM)),
            full_in((1, ID_CODE_DIM)),
        ],
        out_specs=pl.BlockSpec((tile, LANES), lambda i: (i, 0)),
        compiler_params=pltpu.CompilerParams(
            dimension_semantics=("parallel",)),
    )(seed2d, w1, b1_2d, w2, b2_2d)

    # (n_packed, 128) -> (n_rows_padded, 32): free row-major reinterpretation.
    out = packed.reshape(n_rows_padded, ID_CODE_DIM)
    if n_rows_padded != batch_size:
        out = out[:batch_size]
    return out


def reference_forward(batch_size, seed, w1, b1, w2, b2):
    h = jnp.maximum(seed @ w1 + b1, 0.0)
    y = h @ w2 + b2
    return jnp.broadcast_to(y[None, :], (batch_size, ID_CODE_DIM))


if __name__ == "__main__":
    key = jax.random.PRNGKey(0)
    k_seed, k_w1, k_b1, k_w2, k_b2 = jax.random.split(key, 5)

    # Deterministic synthetic parameters (shapes from IDNet.__init__).
    seed_param = jax.random.normal(k_seed, (HIDDEN,), dtype=jnp.float32)
    w1 = jax.random.normal(k_w1, (HIDDEN, HIDDEN), dtype=jnp.float32) * 0.1
    b1 = jax.random.normal(k_b1, (HIDDEN,), dtype=jnp.float32) * 0.1
    w2 = jax.random.normal(k_w2, (HIDDEN, ID_CODE_DIM), dtype=jnp.float32) * 0.1
    b2 = jax.random.normal(k_b2, (ID_CODE_DIM,), dtype=jnp.float32) * 0.1

    # Primary small test: batch divisible by the lane-pack factor.
    batch_size = 4
    out = idnet_forward(batch_size, seed_param, w1, b1, w2, b2)
    out = jax.block_until_ready(out)
    ref = reference_forward(batch_size, seed_param, w1, b1, w2, b2)
    assert out.shape == (batch_size, ID_CODE_DIM)
    assert jnp.allclose(out, ref, atol=1e-5, rtol=1e-5)

    # Tail-handling test: batch not divisible by the pack factor.
    batch_size2 = 6
    out2 = idnet_forward(batch_size2, seed_param, w1, b1, w2, b2)
    out2 = jax.block_until_ready(out2)
    ref2 = reference_forward(batch_size2, seed_param, w1, b1, w2, b2)
    assert out2.shape == (batch_size2, ID_CODE_DIM)
    assert jnp.allclose(out2, ref2, atol=1e-5, rtol=1e-5)

    print("KERNEL_OK")
</pallas_src>

<mosaic_0001>
module attributes {stable_mosaic.version = 11 : i64} {
  func.func @idnet_kernel(%arg0: i32, %arg1: memref<1x32xf32, #tpu.memory_space<vmem>>, %arg2: memref<32x32xf32, #tpu.memory_space<vmem>>, %arg3: memref<1x32xf32, #tpu.memory_space<vmem>>, %arg4: memref<32x32xf32, #tpu.memory_space<vmem>>, %arg5: memref<1x32xf32, #tpu.memory_space<vmem>>, %arg6: memref<8x128xf32, #tpu.memory_space<vmem>>) attributes {dimension_semantics = [#tpu.dimension_semantics<parallel>], iteration_bounds = array<i64: 1>, scalar_prefetch = 0 : i64, scratch_operands = 0 : i64, tpu.core_type = #tpu.core_type<tc>, window_params = [{pipeline_mode = #tpu.pipeline_mode<synchronous>, transform_indices = @transform_0, window_bounds = array<i64: 1, 32>}, {pipeline_mode = #tpu.pipeline_mode<synchronous>, transform_indices = @transform_1, window_bounds = array<i64: 32, 32>}, {pipeline_mode = #tpu.pipeline_mode<synchronous>, transform_indices = @transform_2, window_bounds = array<i64: 1, 32>}, {pipeline_mode = #tpu.pipeline_mode<synchronous>, transform_indices = @transform_3, window_bounds = array<i64: 32, 32>}, {pipeline_mode = #tpu.pipeline_mode<synchronous>, transform_indices = @transform_4, window_bounds = array<i64: 1, 32>}, {transform_indices = @transform_5, window_bounds = array<i64: 8, 128>}]} {
    %c0 = arith.constant 0 : index
    %c0_0 = arith.constant 0 : index
    %0 = vector.load %arg1[%c0, %c0_0] : memref<1x32xf32, #tpu.memory_space<vmem>>, vector<1x32xf32>
    %c0_1 = arith.constant 0 : index
    %c0_2 = arith.constant 0 : index
    %1 = vector.load %arg2[%c0_1, %c0_2] : memref<32x32xf32, #tpu.memory_space<vmem>>, vector<32x32xf32>
    %cst = arith.constant dense<0.000000e+00> : vector<1x32xf32>
    %2 = tpu.matmul %0, %1, %cst {dimension_numbers = #tpu.dot_dimension_numbers<[1], [0], [0], [1], [0, 0, 1, 1], [], []>} : vector<1x32xf32>, vector<32x32xf32>, vector<1x32xf32> -> vector<1x32xf32>
    %c0_3 = arith.constant 0 : index
    %c0_4 = arith.constant 0 : index
    %3 = vector.load %arg3[%c0_3, %c0_4] : memref<1x32xf32, #tpu.memory_space<vmem>>, vector<1x32xf32>
    %4 = arith.addf %2, %3 : vector<1x32xf32>
    %cst_5 = arith.constant 0.000000e+00 : f32
    %5 = vector.broadcast %cst_5 : f32 to vector<1x32xf32>
    %6 = arith.maximumf %4, %5 : vector<1x32xf32>
    %c0_6 = arith.constant 0 : index
    %c0_7 = arith.constant 0 : index
    %7 = vector.load %arg4[%c0_6, %c0_7] : memref<32x32xf32, #tpu.memory_space<vmem>>, vector<32x32xf32>
    %cst_8 = arith.constant dense<0.000000e+00> : vector<1x32xf32>
    %8 = tpu.matmul %6, %7, %cst_8 {dimension_numbers = #tpu.dot_dimension_numbers<[1], [0], [0], [1], [0, 0, 1, 1], [], []>} : vector<1x32xf32>, vector<32x32xf32>, vector<1x32xf32> -> vector<1x32xf32>
    %c0_9 = arith.constant 0 : index
    %c0_10 = arith.constant 0 : index
    %9 = vector.load %arg5[%c0_9, %c0_10] : memref<1x32xf32, #tpu.memory_space<vmem>>, vector<1x32xf32>
    %10 = arith.addf %8, %9 : vector<1x32xf32>
    %11 = tpu.concatenate %10, %10, %10, %10 in 1 : vector<1x32xf32>, vector<1x32xf32>, vector<1x32xf32>, vector<1x32xf32> -> vector<1x128xf32>
    %12 = vector.shape_cast %11 : vector<1x128xf32> to vector<1x128xf32>
    %13 = vector.broadcast %12 : vector<1x128xf32> to vector<8x128xf32>
    %c0_11 = arith.constant 0 : index
    %c0_12 = arith.constant 0 : index
    %14 = vector.load %arg6[%c0_11, %c0_12] : memref<8x128xf32, #tpu.memory_space<vmem>>, vector<8x128xf32>
    tpu.vector_store %arg6[%c0_11, %c0_12], %13 {strides = array<i32>} : memref<8x128xf32, #tpu.memory_space<vmem>>, vector<8x128xf32>,
    return
  }
  func.func @transform_0(%arg0: i32) -> (i32, i32) {
    %c0_i32 = arith.constant 0 : i32
    %c0_i32_0 = arith.constant 0 : i32
    %c0_i32_1 = arith.constant 0 : i32
    return %c0_i32, %c0_i32_0 : i32, i32
  }
  func.func @transform_1(%arg0: i32) -> (i32, i32) {
    %c0_i32 = arith.constant 0 : i32
    %c0_i32_0 = arith.constant 0 : i32
    %c0_i32_1 = arith.constant 0 : i32
    return %c0_i32, %c0_i32_0 : i32, i32
  }
  func.func @transform_2(%arg0: i32) -> (i32, i32) {
    %c0_i32 = arith.constant 0 : i32
    %c0_i32_0 = arith.constant 0 : i32
    %c0_i32_1 = arith.constant 0 : i32
    return %c0_i32, %c0_i32_0 : i32, i32
  }
  func.func @transform_3(%arg0: i32) -> (i32, i32) {
    %c0_i32 = arith.constant 0 : i32
    %c0_i32_0 = arith.constant 0 : i32
    %c0_i32_1 = arith.constant 0 : i32
    return %c0_i32, %c0_i32_0 : i32, i32
  }
  func.func @transform_4(%arg0: i32) -> (i32, i32) {
    %c0_i32 = arith.constant 0 : i32
    %c0_i32_0 = arith.constant 0 : i32
    %c0_i32_1 = arith.constant 0 : i32
    return %c0_i32, %c0_i32_0 : i32, i32
  }
  func.func @transform_5(%arg0: i32) -> (i32, i32) {
    %c0_i32 = arith.constant 0 : i32
    %c0_i32_0 = arith.constant 0 : i32
    return %arg0, %c0_i32 : i32, i32
  }
}

</mosaic_0001>

<bundles_post_ra>
// kernel: tpu_custom_call.1
= control target key start
LH: loop header
LB: loop body
LE: loop exit
PB: predicated region body
PF: predicated region fallthrough
CT: control target
= control target key end

     0   :  { %10 = vsyncpa [#allocation3], 0  ;;  %s454_s0 = inlined_call_operand.hbm [shape: f32[1,32], index: 0, kind: input, shape index: {}]   ;;  %s455_s1 = inlined_call_operand.hbm [shape: f32[32,32], index: 1, kind: input, shape index: {}]   ;;  %s456_s2 = inlined_call_operand.vmem [shape: f32[1,32], index: 2, kind: input, shape index: {}]   ;;  %s457_s3 = inlined_call_operand.hbm [shape: f32[32,32], index: 3, kind: input, shape index: {}]   ;;  %s458_s4 = inlined_call_operand.vmem [shape: f32[1,32], index: 4, kind: input, shape index: {}]   ;;  %s459_s5 = inlined_call_operand.hbm [shape: f32[1,128], index: 5, kind: output, shape index: {}]  }
   0x1   :  { %11 = vsyncpa [#allocation6], 0 }
   0x2   :  { %12 = vsyncpa [#allocation4], 0  ;;  %s390_s18 = smov [#allocation5]  }
   0x3   :  { %s28_s19 = sshll.u32 %s390_s18, 4  ;;  %s29_s19 = int_to_ptr.vmem [resolvable:$true] %s28_s19 }
   0x4   :  { %s312_s20 = scalar_lea.vmem %s29_s19, 512  ;;  %p317_p1 = scmp.lt.s32.totalorder %s29_s19, %s29_s19 }
   0x5   :  { %p313_p0 = scmp.ne.s32.totalorder %s29_s19, %s312_s20  ;;  %p318_p2 = scmp.lt.s32.totalorder %s312_s20, %s312_s20 }
   0x7   :  { %p319_p3 = por %p318_p2, %p317_p1 }
   0x9   :  { %p320_p4 = pnand %p319_p3, %p313_p0 }
   0xb   :  { %323 = shalt.err (!%p320_p4)
}
   0xc   :  { %s391_s21 = smov 128   ;;  %s392_s22 = smov 8  }
   0xd   :  { %34 = dma.hbm_to_vmem [thread:$0]  %s455_s1, 512, %s29_s19, [#allocation6], %s391_s21, %s391_s21, %s392_s22  }
   0xe   :  { %s393_s25 = smov [#allocation2]   ;;  %s394_s27 = smov [#allocation7]  }
   0xf   :  { %s19_s26 = sshll.u32 %s393_s25, 4  ;;  %s42_s28 = sshll.u32 %s394_s27, 4  ;;  %s20_s26 = int_to_ptr.vmem [resolvable:$true] %s19_s26  ;;  %s43_s28 = int_to_ptr.vmem [resolvable:$true] %s42_s28 }
  0x10   :  { %s332_s29 = scalar_lea.vmem %s20_s26, 16  ;;  %s336_s30 = scalar_lea.vmem %s20_s26, 32 }
  0x11   :  { %p333_p5 = scmp.ne.s32.totalorder %s20_s26, %s332_s29  ;;  %p337_p6 = scmp.lt.s32.totalorder %s20_s26, %s20_s26 }
  0x12   :  { %p338_p7 = scmp.lt.s32.totalorder %s336_s30, %s332_s29 }
  0x14   :  { %p339_p8 = por %p338_p7, %p337_p6 }
  0x16   :  { %p340_p9 = pnand %p339_p8, %p333_p5 }
  0x18   :  { %343 = shalt.err (!%p340_p9)
}
  0x19   :  { %22 = dma.hbm_to_vmem [thread:$0]  %s454_s0, 16, %s20_s26, [#allocation3]  }
  0x1a   :  { %s352_s8 = scalar_lea.vmem %s43_s28, 512  ;;  %p357_p11 = scmp.lt.s32.totalorder %s43_s28, %s43_s28 }
  0x1b   :  { %p353_p10 = scmp.ne.s32.totalorder %s43_s28, %s352_s8  ;;  %p358_p12 = scmp.lt.s32.totalorder %s352_s8, %s352_s8 }
  0x1d   :  { %p359_p13 = por %p358_p12, %p357_p11 }
  0x1f   :  { %p360_p0 = pnand %p359_p13, %p353_p10 }
  0x21   :  { %363 = shalt.err (!%p360_p0)
}
  0x22   :  { %48 = dma.hbm_to_vmem [thread:$0]  %s457_s3, 512, %s43_s28, [#allocation6], %s391_s21, %s391_s21, %s392_s22  }
  0x23   :  { %384 = dma.done.wait [#allocation3], 16  }
  0x24   :  { %385 = vsyncadd [#allocation3], 4294967280 }
  0x25   :  { %386 = dma.done.wait [#allocation6], 1024  }
  0x26   :  { %387 = vsyncadd [#allocation6], 4294966272  ;;  %v395_v0 = vmov 0.0   ;;  %vm396_vm0 = vmmov 0   ;;  %v64_v1 = vld [vmem:[#allocation5 + $0x18] sm:$0xff]  ;;  %v63_v2 = vld [vmem:[#allocation5 + $0x10] sm:$0xff]  ;;  %v234_v19 = vlaneseq }
  0x27   :  { %269 = vmatprep.subr.mxu0 %v395_v0  ;;  %277 = vmatprep.mubr.msk.f32.mxu0 %vm396_vm0, %v395_v0  ;;  %v144_v3 = vld [vmem:[#allocation7 + $0x18] sm:$0xff]  ;;  %v62_v4 = vld [vmem:[#allocation5 + $0x8] sm:$0xff]  ;;  %v61_v5 = vld [vmem:[#allocation5] sm:$0xff]  ;;  %vm66_vm1 = vcmask 261120   ;;  %s397_s12 = smov 96   ;;  %s398_s13 = smov 32  }
  0x28   :  { %280 = vmatprep.subr.mxu1 %v395_v0  ;;  %288 = vmatprep.mubr.msk.f32.mxu1 %vm396_vm0, %v395_v0  ;;  %v60_v6 = vld [vmem:[#allocation2] sm:$0x1]  ;;  %v143_v7 = vld [vmem:[#allocation7 + $0x10] sm:$0xff]  ;;  %v142_v8 = vld [vmem:[#allocation7 + $0x8] sm:$0xff]  ;;  %s399_s14 = smov 64   ;;  %v235_v20 = vshrl.u32 %v234_v19, 7 }
  0x29   :  { %270 = vmatpush3.msra.mxu0 %v64_v1  ;;  %281 = vmatpush3.msra.mxu1 %v144_v3  ;;  %v141_v9 = vld [vmem:[#allocation7] sm:$0xff]  ;;  %v65_v10 = vld [vmem:[%s456_s2] sm:$0x1]  ;;  %vm230_vm2 = vcmask 523264   ;;  %vm232_vm3 = vcmask 785408  }
  0x2a   :  { %271 = vmatprep.subr.mxu0 %v395_v0  ;;  %282 = vmatprep.subr.mxu1 %v395_v0  ;;  %v145_v15 = vld [vmem:[%s458_s4] sm:$0x1]  ;;  %v236_v22 = vsub.s32 0, %v235_v20 }
  0x2b   :  { %272 = vmatpush3.msra.mxu0 %v63_v2  ;;  %283 = vmatpush3.msra.mxu1 %v143_v7 }
  0x2c   :  { %273 = vmatprep.subr.mxu0 %v395_v0  ;;  %284 = vmatprep.subr.mxu1 %v395_v0 }
  0x2d   :  { %274 = vmatpush3.msra.mxu0 %v62_v4  ;;  %285 = vmatpush3.msra.mxu1 %v142_v8 }
  0x2e   :  { %275 = vmatprep.subr.mxu0 %v395_v0  ;;  %286 = vmatprep.subr.mxu1 %v395_v0 }
  0x2f   :  { %276 = vmatpush3.msra.mxu0 %v61_v5  ;;  %287 = vmatpush3.msra.mxu1 %v141_v9 }
  0x30   :  { %278 = vmatmul.mubr.msk.f32.vlgmr.msra.gmra.mxu0 %vm66_vm1, %v60_v6 }
  0xf0   :  { %v136_v11 = vpop.f32.mrf.mxu0 }
  0xf1   :  { %v137_v12 = vadd.f32 %v136_v11, %v65_v10 }
  0xf2   :  { %v279_v13 = vpop.f32.mrf.mxu0 }
  0xf3   :  { %v140_v14 = vmax.f32 %v137_v12, 0.0 }
  0xf5   :  { %289 = vmatmul.mubr.msk.f32.vlgmr.msra.gmra.mxu1 %vm66_vm1, %v140_v14 }
 0x1b5   :  { %v215_v16 = vpop.f32.mrf.mxu1 }
 0x1b6   :  { %v216_v17 = vadd.f32 %v215_v16, %v145_v15 }
 0x1b7   :  { %v290_v18 = vpop.f32.mrf.mxu1 }
 0x1b8   :  { %226 = vrot.lane.b32.xlu1 %v216_v17, %s397_s12  ;;  %220 = vrot.lane.b32.xlu0 %v216_v17, %s398_s13 }
 0x1bc   :  { %223 = vrot.lane.b32.xlu0 %v216_v17, %s399_s14 }
 0x22a   :  { %v221_v21 = vpop.permute.xlu0 %220  ;;  %v227_v25 = vpop.permute.xlu1 %226 }
 0x22b   :  { %v229_v23 = vsel %vm66_vm1, %v216_v17, %v221_v21 }
 0x22e   :  { %v224_v24 = vpop.permute.xlu0 %223 }
 0x22f   :  { %v231_v26 = vsel %vm230_vm2, %v229_v23, %v224_v24 }
 0x230   :  { %v233_v27 = vsel %vm232_vm3, %v231_v26, %v227_v25 }
 0x231   :  { %v237_v28 = vrot.slane %v233_v27, %v236_v22 }
 0x233   :  { %238 = vst [vmem:[#allocation8] sm:$0xff] %v237_v28 }
 0x234   :  { %243 = vsyncadd [#allocation4], 112  ;;  %s400_s2 = smov [#allocation8]  }
 0x235   :  { %s244_s4 = sshll.u32 %s400_s2, 4  ;;  %s245_s4 = int_to_ptr.vmem [resolvable:$true] %s244_s4 }
 0x236   :  { %s364_s15 = scalar_lea.vmem %s245_s4, 16  ;;  %s368_s16 = scalar_lea.vmem %s245_s4, 128 }
 0x237   :  { %p365_p1 = scmp.ne.s32.totalorder %s245_s4, %s364_s15  ;;  %p369_p2 = scmp.lt.s32.totalorder %s245_s4, %s245_s4 }
 0x238   :  { %p370_p3 = scmp.lt.s32.totalorder %s368_s16, %s364_s15 }
 0x23a   :  { %p371_p4 = por %p370_p3, %p369_p2 }
 0x23c   :  { %p372_p5 = pnand %p371_p4, %p365_p1 }
 0x23e   :  { %375 = shalt.err (!%p372_p5)
}
 0x23f   :  { %s401_s17 = smov 16   ;;  %s402_s18 = smov 1  }
 0x240   :  { %250 = dma.vmem_to_hbm [thread:$0]  %s245_s4, 16, %s459_s5, [#allocation4], %s401_s17, %s401_s17, %s402_s18  }
 0x241   :  { %388 = dma.done.wait [#allocation4], 128  }
 0x242   :  { %389 = vsyncadd [#allocation4], 4294967168 }
 0x243   :  { %254 = vsyncpa [#allocation3], 1 }
 0x244   :  { %255 = vsyncpa [#allocation6], 1 }
 0x245   :  { %256 = vsyncpa [#allocation4], 1 }

</bundles_post_ra>
